<compile_context>
chip_gen: v7x
topology: tpu7x:2x2x1
jax: 0.10.0
libtpu: 0.0.40
codegen_flags: <defaults>
</compile_context>

<pallas_src>
import functools

import jax
import jax.numpy as jnp
from jax.experimental import pallas as pl
from jax.experimental.pallas import tpu as pltpu


def siamese_kernel(win_ref, wc_ref, bc_ref, wf_ref, ws1_ref, bfc_ref, out_ref):
    # win_ref: (2*BT*L, 2E) pre-unfolded conv windows, branch-major then example.
    rows = win_ref.shape[0]
    bt = out_ref.shape[0]
    c_pad = bc_ref.shape[1]
    L = rows // (2 * bt)

    # One MXU push over both branches and the whole batch tile (no input reshape).
    y = jnp.dot(win_ref[...], wc_ref[...],
                preferred_element_type=jnp.float32)                   # (rows, C_PAD)

    # Global max pool per (branch, example). The wrap-around window slot holds a
    # duplicate of a valid window (set in the wrapper), so no masking is needed.
    # Bias add + ReLU hoisted past the max (monotone, bias constant over windows).
    pooled = jnp.max(y.reshape(2 * bt, L, c_pad), axis=1)             # (2*BT, C_PAD)
    pooled = jnp.maximum(pooled + bc_ref[...], 0.0)

    o1 = pooled[:bt]                                                  # (BT, C_PAD)
    o2 = pooled[bt:]                                                  # (BT, C_PAD)
    s3 = o1 * o2
    s2 = jnp.abs(o1 - o2)

    # One cross-lane reduction pass (XLU) for the three similarity sums.
    sums = jnp.sum(jnp.concatenate([s3, o1 * o1, o2 * o2], axis=0),
                   axis=1, keepdims=True)                             # (3*BT, 1)
    d12 = sums[:bt]
    nrm = jnp.sqrt(sums[bt:2 * bt]) * jnp.sqrt(sums[2 * bt:])
    # Exact f32 divide: pl.reciprocal(approx=True) broke the 2e-4 numerical check.
    s1 = d12 / jnp.maximum(nrm, 1e-8)                                 # (BT, 1)

    # Fused fc: lane-concat of 128-wide groups -> single K=512 matmul, then the
    # rank-1 cosine term and the bias.
    feat = jnp.concatenate([o1, o2, s2, s3], axis=1)                  # (BT, 4*C_PAD)
    out = jnp.dot(feat, wf_ref[...], preferred_element_type=jnp.float32)
    out = out + s1 * ws1_ref[...] + bfc_ref[...]
    out_ref[...] = out.astype(out_ref.dtype)


@functools.partial(jax.jit, static_argnames=("class_num", "b_tile"))
def siamese_forward(input1, input2, emb_table, wc_pad, bc_pad, wf_fused, ws1_pad,
                    bfc_pad, *, class_num, b_tile):
    """Whole forward under one jit: embedding gather + window unfold + kernel + slice."""
    B, L = input1.shape
    E = emb_table.shape[1]
    assert B % b_tile == 0, "batch must be divisible by the batch tile"
    num_tiles = B // b_tile
    cls_pad = bfc_pad.shape[1]

    # Embedding lookup (data-dependent gather) stays in fused XLA glue.
    emb1 = emb_table[input1]                                          # (B, L, E)
    emb2 = emb_table[input2]                                          # (B, L, E)

    # Pre-unfold the kernel_size=2 conv windows; duplicate the last VALID window into
    # the wrap-around slot so the in-kernel max over L rows is exact (no mask).
    x = jnp.stack([emb1, emb2], axis=0)                               # (2, B, L, E)
    win = jnp.concatenate([x[:, :, :-1, :], x[:, :, 1:, :]], axis=-1) # (2, B, L-1, 2E)
    win = jnp.concatenate([win, win[:, :, -1:, :]], axis=2)           # (2, B, L, 2E)

    # Lay out as (num_tiles, 2*b_tile*L, 2E) so the kernel block feeds the MXU
    # without any in-VMEM reshape of the input (lane dim 2E stays last).
    win = win.reshape(2, num_tiles, b_tile, L, 2 * E)
    win = win.transpose(1, 0, 2, 3, 4).reshape(num_tiles, 2 * b_tile * L, 2 * E)
    rows = 2 * b_tile * L

    full = lambda a: pl.BlockSpec(a.shape, lambda b: tuple(0 for _ in a.shape))

    out = pl.pallas_call(
        siamese_kernel,
        out_shape=jax.ShapeDtypeStruct((B, cls_pad), jnp.float32),
        grid_spec=pltpu.PrefetchScalarGridSpec(
            num_scalar_prefetch=0,
            grid=(num_tiles,),
            in_specs=[
                pl.BlockSpec((None, rows, 2 * E), lambda b: (b, 0, 0)),  # windows
                full(wc_pad), full(bc_pad),
                full(wf_fused), full(ws1_pad), full(bfc_pad),
            ],
            out_specs=pl.BlockSpec((b_tile, cls_pad), lambda b: (b, 0)),
        ),
        compiler_params=pltpu.CompilerParams(dimension_semantics=("parallel",)),
    )(win, wc_pad, bc_pad, wf_fused, ws1_pad, bfc_pad)
    return out[:, :class_num]


def reference_forward(emb1, emb2, w_conv, b_conv, w_fc, b_fc):
    # Pure-JAX f32 reference matching the PyTorch module semantics.
    wmat = jnp.concatenate([w_conv[:, :, 0], w_conv[:, :, 1]], axis=1).T  # (2E, 100)

    def branch(x):  # (B, L, E)
        win = jnp.concatenate([x[:, :-1, :], x[:, 1:, :]], axis=-1)       # (B, L-1, 2E)
        y = jnp.einsum("blf,fo->blo", win, wmat) + b_conv                 # (B, L-1, 100)
        y = jnp.maximum(y, 0.0)
        return jnp.max(y, axis=1)                                         # (B, 100)

    o1, o2 = branch(emb1), branch(emb2)
    dot = jnp.sum(o1 * o2, axis=1, keepdims=True)
    n1 = jnp.linalg.norm(o1, axis=1, keepdims=True)
    n2 = jnp.linalg.norm(o2, axis=1, keepdims=True)
    s1 = dot / jnp.maximum(n1 * n2, 1e-8)
    feat = jnp.concatenate([o1, o2, s1, jnp.abs(o1 - o2), o1 * o2], axis=1)
    return feat @ w_fc + b_fc


if __name__ == "__main__":
    # args
    vocab_size, embedding_dim, pad_id, class_num = 50, 32, 0, 3
    B, L = 16, 8
    # grid=(2,) "parallel" so both v7x TensorCores get work; on single-TC v5e/v6e,
    # set B_TILE = B for one fatter grid step instead.
    B_TILE = B // 2
    C_OUT = 100            # conv out_channels hardcoded in the module
    C_PAD, CLS_PAD = 128, 128

    key = jax.random.PRNGKey(0)
    k_emb, k_wc, k_bc, k_wfc, k_bfc, k_i1, k_i2 = jax.random.split(key, 7)

    # parameters (deterministic synthetic init, PyTorch-style shapes)
    emb_table = 0.1 * jax.random.normal(k_emb, (vocab_size, embedding_dim), jnp.float32)
    emb_table = emb_table.at[pad_id].set(0.0)                          # padding_idx row

    w_conv = 0.1 * jax.random.normal(k_wc, (C_OUT, embedding_dim, 2), jnp.float32)  # (O,Cin,K)
    b_conv = 0.1 * jax.random.normal(k_bc, (C_OUT,), jnp.float32)
    w_fc = 0.1 * jax.random.normal(k_wfc, (4 * C_OUT + 1, class_num), jnp.float32)  # (401, C)
    b_fc = 0.1 * jax.random.normal(k_bfc, (class_num,), jnp.float32)

    # ---- weight prep for the kernel (lane-dense, padded to 128; hoisted, done once) ----
    wc_mat = jnp.concatenate([w_conv[:, :, 0], w_conv[:, :, 1]], axis=1).T   # (2E, 100)
    wc_pad = jnp.pad(wc_mat, ((0, 0), (0, C_PAD - C_OUT)))                   # (2E, 128)
    bc_pad = jnp.pad(b_conv, (0, C_PAD - C_OUT)).reshape(1, C_PAD)           # (1, 128)

    def pad_block(w):  # (100, class_num) -> (128, 128), zero padded
        return jnp.pad(w, ((0, C_PAD - w.shape[0]), (0, CLS_PAD - w.shape[1])))

    # fc weight groups in the kernel's feature order [o1 | o2 | s2 | s3] -> (512, 128)
    w_o1 = pad_block(w_fc[0:C_OUT])
    w_o2 = pad_block(w_fc[C_OUT:2 * C_OUT])
    w_s2 = pad_block(w_fc[2 * C_OUT + 1:3 * C_OUT + 1])
    w_s3 = pad_block(w_fc[3 * C_OUT + 1:4 * C_OUT + 1])
    wf_fused = jnp.concatenate([w_o1, w_o2, w_s2, w_s3], axis=0)             # (512, 128)
    ws1_pad = jnp.pad(w_fc[2 * C_OUT:2 * C_OUT + 1],
                      ((0, 0), (0, CLS_PAD - class_num)))                    # (1, 128)
    bfc_pad = jnp.pad(b_fc.reshape(1, -1), ((0, 0), (0, CLS_PAD - class_num)))  # (1, 128)

    # inputs: integer token ids (B, L)
    input1 = jax.random.randint(k_i1, (B, L), 0, vocab_size, jnp.int32)
    input2 = jax.random.randint(k_i2, (B, L), 0, vocab_size, jnp.int32)

    out = siamese_forward(input1, input2, emb_table, wc_pad, bc_pad, wf_fused,
                          ws1_pad, bfc_pad, class_num=class_num, b_tile=B_TILE)
    out = jax.block_until_ready(out)

    emb1 = emb_table[input1]
    emb2 = emb_table[input2]
    ref = reference_forward(emb1, emb2, w_conv, b_conv, w_fc, b_fc)
    assert out.shape == (B, class_num)
    # Exact f32 math everywhere (cosine uses a true divide now); only matmul
    # accumulation-order differences remain, far inside this tolerance.
    assert jnp.allclose(out, ref, atol=1e-4, rtol=1e-4), (out, ref)
    print("KERNEL_OK")
</pallas_src>

<mosaic_0001>
module attributes {stable_mosaic.version = 11 : i64} {
  func.func @siamese_kernel(%arg0: i32, %arg1: memref<1x128x64xf32, #tpu.memory_space<vmem>>, %arg2: memref<64x128xf32, #tpu.memory_space<vmem>>, %arg3: memref<1x128xf32, #tpu.memory_space<vmem>>, %arg4: memref<512x128xf32, #tpu.memory_space<vmem>>, %arg5: memref<1x128xf32, #tpu.memory_space<vmem>>, %arg6: memref<1x128xf32, #tpu.memory_space<vmem>>, %arg7: memref<8x128xf32, #tpu.memory_space<vmem>>) attributes {dimension_semantics = [#tpu.dimension_semantics<parallel>], iteration_bounds = array<i64: 2>, scalar_prefetch = 0 : i64, scratch_operands = 0 : i64, tpu.core_type = #tpu.core_type<tc>, window_params = [{transform_indices = @transform_0, window_bounds = array<i64: 1, 128, 64>}, {pipeline_mode = #tpu.pipeline_mode<synchronous>, transform_indices = @transform_1, window_bounds = array<i64: 64, 128>}, {pipeline_mode = #tpu.pipeline_mode<synchronous>, transform_indices = @transform_2, window_bounds = array<i64: 1, 128>}, {pipeline_mode = #tpu.pipeline_mode<synchronous>, transform_indices = @transform_3, window_bounds = array<i64: 512, 128>}, {pipeline_mode = #tpu.pipeline_mode<synchronous>, transform_indices = @transform_4, window_bounds = array<i64: 1, 128>}, {pipeline_mode = #tpu.pipeline_mode<synchronous>, transform_indices = @transform_5, window_bounds = array<i64: 1, 128>}, {transform_indices = @transform_6, window_bounds = array<i64: 8, 128>}]} {
    %c0 = arith.constant 0 : index
    %c0_0 = arith.constant 0 : index
    %c0_1 = arith.constant 0 : index
    %0 = vector.load %arg1[%c0, %c0_0, %c0_1] : memref<1x128x64xf32, #tpu.memory_space<vmem>>, vector<1x128x64xf32>
    %1 = vector.shape_cast %0 : vector<1x128x64xf32> to vector<128x64xf32>
    %c0_2 = arith.constant 0 : index
    %c0_3 = arith.constant 0 : index
    %2 = vector.load %arg2[%c0_2, %c0_3] : memref<64x128xf32, #tpu.memory_space<vmem>>, vector<64x128xf32>
    %cst = arith.constant dense<0.000000e+00> : vector<128x128xf32>
    %3 = tpu.matmul %1, %2, %cst {dimension_numbers = #tpu.dot_dimension_numbers<[1], [0], [0], [1], [0, 0, 1, 1], [], []>} : vector<128x64xf32>, vector<64x128xf32>, vector<128x128xf32> -> vector<128x128xf32>
    %4 = vector.shape_cast %3 : vector<128x128xf32> to vector<16x8x128xf32>
    %cst_4 = arith.constant dense<0xFF800000> : vector<16x128xf32>
    %5 = vector.multi_reduction <maximumf>, %4, %cst_4 [1] : vector<16x8x128xf32> to vector<16x128xf32>
    %c0_5 = arith.constant 0 : index
    %c0_6 = arith.constant 0 : index
    %6 = vector.load %arg3[%c0_5, %c0_6] : memref<1x128xf32, #tpu.memory_space<vmem>>, vector<1x128xf32>
    %7 = vector.broadcast %6 : vector<1x128xf32> to vector<16x128xf32>
    %8 = arith.addf %5, %7 : vector<16x128xf32>
    %cst_7 = arith.constant 0.000000e+00 : f32
    %9 = vector.broadcast %cst_7 : f32 to vector<16x128xf32>
    %10 = arith.maximumf %8, %9 : vector<16x128xf32>
    %11 = vector.extract_strided_slice %10 {offsets = [0, 0], sizes = [8, 128], strides = [1, 1]} : vector<16x128xf32> to vector<8x128xf32>
    %12 = vector.extract_strided_slice %10 {offsets = [8, 0], sizes = [8, 128], strides = [1, 1]} : vector<16x128xf32> to vector<8x128xf32>
    %13 = arith.mulf %11, %12 : vector<8x128xf32>
    %14 = arith.subf %11, %12 : vector<8x128xf32>
    %15 = math.absf %14 : vector<8x128xf32>
    %16 = arith.mulf %11, %11 : vector<8x128xf32>
    %17 = arith.mulf %12, %12 : vector<8x128xf32>
    %18 = tpu.concatenate %13, %16, %17 in 0 : vector<8x128xf32>, vector<8x128xf32>, vector<8x128xf32> -> vector<24x128xf32>
    %cst_8 = arith.constant dense<0.000000e+00> : vector<24xf32>
    %19 = vector.multi_reduction <add>, %18, %cst_8 [1] : vector<24x128xf32> to vector<24xf32>
    %20 = vector.shape_cast %19 : vector<24xf32> to vector<24x1xf32>
    %21 = vector.extract_strided_slice %20 {offsets = [0, 0], sizes = [8, 1], strides = [1, 1]} : vector<24x1xf32> to vector<8x1xf32>
    %22 = vector.extract_strided_slice %20 {offsets = [8, 0], sizes = [8, 1], strides = [1, 1]} : vector<24x1xf32> to vector<8x1xf32>
    %23 = math.sqrt %22 : vector<8x1xf32>
    %24 = vector.extract_strided_slice %20 {offsets = [16, 0], sizes = [8, 1], strides = [1, 1]} : vector<24x1xf32> to vector<8x1xf32>
    %25 = math.sqrt %24 : vector<8x1xf32>
    %26 = arith.mulf %23, %25 : vector<8x1xf32>
    %cst_9 = arith.constant 9.99999993E-9 : f32
    %27 = vector.broadcast %cst_9 : f32 to vector<8x1xf32>
    %28 = arith.maximumf %26, %27 : vector<8x1xf32>
    %29 = arith.divf %21, %28 : vector<8x1xf32>
    %30 = tpu.concatenate %11, %12, %15, %13 in 1 : vector<8x128xf32>, vector<8x128xf32>, vector<8x128xf32>, vector<8x128xf32> -> vector<8x512xf32>
    %c0_10 = arith.constant 0 : index
    %c0_11 = arith.constant 0 : index
    %31 = vector.load %arg4[%c0_10, %c0_11] : memref<512x128xf32, #tpu.memory_space<vmem>>, vector<512x128xf32>
    %cst_12 = arith.constant dense<0.000000e+00> : vector<8x128xf32>
    %32 = tpu.matmul %30, %31, %cst_12 {dimension_numbers = #tpu.dot_dimension_numbers<[1], [0], [0], [1], [0, 0, 1, 1], [], []>} : vector<8x512xf32>, vector<512x128xf32>, vector<8x128xf32> -> vector<8x128xf32>
    %c0_13 = arith.constant 0 : index
    %c0_14 = arith.constant 0 : index
    %33 = vector.load %arg5[%c0_13, %c0_14] : memref<1x128xf32, #tpu.memory_space<vmem>>, vector<1x128xf32>
    %34 = vector.broadcast %29 : vector<8x1xf32> to vector<8x128xf32>
    %35 = vector.broadcast %33 : vector<1x128xf32> to vector<8x128xf32>
    %36 = arith.mulf %34, %35 : vector<8x128xf32>
    %37 = arith.addf %32, %36 : vector<8x128xf32>
    %c0_15 = arith.constant 0 : index
    %c0_16 = arith.constant 0 : index
    %38 = vector.load %arg6[%c0_15, %c0_16] : memref<1x128xf32, #tpu.memory_space<vmem>>, vector<1x128xf32>
    %39 = vector.broadcast %38 : vector<1x128xf32> to vector<8x128xf32>
    %40 = arith.addf %37, %39 : vector<8x128xf32>
    %c0_17 = arith.constant 0 : index
    %c0_18 = arith.constant 0 : index
    %41 = vector.load %arg7[%c0_17, %c0_18] : memref<8x128xf32, #tpu.memory_space<vmem>>, vector<8x128xf32>
    tpu.vector_store %arg7[%c0_17, %c0_18], %40 {strides = array<i32>} : memref<8x128xf32, #tpu.memory_space<vmem>>, vector<8x128xf32>,
    return
  }
  func.func @transform_0(%arg0: i32) -> (i32, i32, i32) {
    %c0_i32 = arith.constant 0 : i32
    %c0_i32_0 = arith.constant 0 : i32
    %c0_i32_1 = arith.constant 0 : i32
    return %arg0, %c0_i32, %c0_i32_0 : i32, i32, i32
  }
  func.func @transform_1(%arg0: i32) -> (i32, i32) {
    %c0_i32 = arith.constant 0 : i32
    %c0_i32_0 = arith.constant 0 : i32
    %c0_i32_1 = arith.constant 0 : i32
    return %c0_i32, %c0_i32_0 : i32, i32
  }
  func.func @transform_2(%arg0: i32) -> (i32, i32) {
    %c0_i32 = arith.constant 0 : i32
    %c0_i32_0 = arith.constant 0 : i32
    %c0_i32_1 = arith.constant 0 : i32
    return %c0_i32, %c0_i32_0 : i32, i32
  }
  func.func @transform_3(%arg0: i32) -> (i32, i32) {
    %c0_i32 = arith.constant 0 : i32
    %c0_i32_0 = arith.constant 0 : i32
    %c0_i32_1 = arith.constant 0 : i32
    return %c0_i32, %c0_i32_0 : i32, i32
  }
  func.func @transform_4(%arg0: i32) -> (i32, i32) {
    %c0_i32 = arith.constant 0 : i32
    %c0_i32_0 = arith.constant 0 : i32
    %c0_i32_1 = arith.constant 0 : i32
    return %c0_i32, %c0_i32_0 : i32, i32
  }
  func.func @transform_5(%arg0: i32) -> (i32, i32) {
    %c0_i32 = arith.constant 0 : i32
    %c0_i32_0 = arith.constant 0 : i32
    %c0_i32_1 = arith.constant 0 : i32
    return %c0_i32, %c0_i32_0 : i32, i32
  }
  func.func @transform_6(%arg0: i32) -> (i32, i32) {
    %c0_i32 = arith.constant 0 : i32
    %c0_i32_0 = arith.constant 0 : i32
    return %arg0, %c0_i32 : i32, i32
  }
}

</mosaic_0001>

<bundles_post_ra>
// kernel: siamese_forward.1
= control target key start
LH: loop header
LB: loop body
LE: loop exit
PB: predicated region body
PF: predicated region fallthrough
CT: control target
= control target key end

     0   :  { %s1387_s21 = smov 0   ;;  %s1887_s0 = inlined_call_operand.vmem [shape: f32[2,128,64], index: 0, kind: input, shape index: {}]   ;;  %s1888_s1 = inlined_call_operand.vmem [shape: f32[64,128], index: 1, kind: input, shape index: {}]   ;;  %s1889_s2 = inlined_call_operand.vmem [shape: f32[1,128], index: 2, kind: input, shape index: {}]   ;;  %s1890_s3 = inlined_call_operand.vmem [shape: f32[512,128], index: 3, kind: input, shape index: {}]   ;;  %s1891_s4 = inlined_call_operand.vmem [shape: f32[1,128], index: 4, kind: input, shape index: {}]   ;;  %s1892_s5 = inlined_call_operand.vmem [shape: f32[1,128], index: 5, kind: input, shape index: {}]   ;;  %s1893_s6 = inlined_call_operand.vmem [shape: f32[16,128], index: 6, kind: output, shape index: {}]  }
   0x1 LB: > { %s1086_s22 = sadd.s32 4294967295, %s1350_s21   ;;  %p1090_p0 = scmp.ge.s32.totalorder %s1350_s21, 1  ;;  %s1350_s21 = sphi %s1387_s21, %s16_s21  }
   0x2   : > { %p212_p1 = scmp.lt.s32.totalorder %s1350_s21, 3 }
   0x4   : > { %p213_p2 = pnand %p1090_p0, %p212_p1 }
   0x5   : > { %v266_v0 = vld [vmem:[%s1888_s1] sm:$0xff] (!%p213_p2)  ;;  %v267_v1 = vld [vmem:[%s1888_s1 + $0x8] sm:$0xff] (!%p213_p2)  ;;  %v268_v2 = vld [vmem:[%s1888_s1 + $0x10] sm:$0xff] (!%p213_p2)  ;;  %p241_p3 = scmp.lt.s32.totalorder (!%p213_p2), %s1086_s22, 1  ;;  %vm274_vm0 = vcmask (!%p213_p2), 523264   ;;  %vm652_vm1 = vcmask (!%p213_p2), 1041409  }
   0x6   : > { %216 = sbr.rel (%p213_p2) target bundleno = 528 (0x210), region = 44  ;;  %v1250_v3 = vpack.c.bf16 (!%p213_p2), %v267_v1, %v266_v0  ;;  %v269_v4 = vld [vmem:[%s1888_s1 + $0x18] sm:$0xff] (!%p213_p2)  ;;  %v270_v6 = vld [vmem:[%s1888_s1 + $0x20] sm:$0xff] (!%p213_p2)  ;;  %v271_v7 = vld [vmem:[%s1888_s1 + $0x28] sm:$0xff] (!%p213_p2)  ;;  %vm655_vm2 = vcmask (!%p213_p2), 1042434   ;;  %vm658_vm3 = vcmask (!%p213_p2), 1043459  }
   0x7   : > { %v1254_v5 = vpack.c.bf16 (!%p213_p2), %v269_v4, %v268_v2  ;;  %v1258_v8 = vpack.c.bf16 (!%p213_p2), %v271_v7, %v270_v6  ;;  %v272_v9 = vld [vmem:[%s1888_s1 + $0x30] sm:$0xff] (!%p213_p2)  ;;  %v273_v10 = vld [vmem:[%s1888_s1 + $0x38] sm:$0xff] (!%p213_p2)  ;;  %v828_v28 = vld [vmem:[%s1890_s3 + $0x80] sm:$0xff] (!%p213_p2)  ;;  %vm661_vm4 = vcmask (!%p213_p2), 1044484   ;;  %vm664_vm5 = vcmask (!%p213_p2), 1045509  }
   0x8   : > { %1251 = vmatprep.subr.bf16.mxu0 (!%p213_p2), %v1250_v3  ;;  %v1262_v12 = vpack.c.bf16 (!%p213_p2), %v273_v10, %v272_v9  ;;  %v829_v29 = vld [vmem:[%s1890_s3 + $0x88] sm:$0xff] (!%p213_p2)  ;;  %v812_v31 = vld [vmem:[%s1890_s3] sm:$0xff] (!%p213_p2)  ;;  %v830_v39 = vld [vmem:[%s1890_s3 + $0x90] sm:$0xff] (!%p213_p2)  ;;  %vm667_vm6 = vcmask (!%p213_p2), 1046534   ;;  %vm670_vm7 = vcmask (!%p213_p2), 1047559  }
   0x9   : > { %1253 = vmatpush3.bf16.msra.mxu0 (!%p213_p2), %v1250_v3  ;;  %v1266_v30 = vpack.c.bf16 (!%p213_p2), %v829_v29, %v828_v28  ;;  %v813_v32 = vld [vmem:[%s1890_s3 + $0x8] sm:$0xff] (!%p213_p2)  ;;  %v860_v34 = vld [vmem:[%s1890_s3 + $0x180] sm:$0xff] (!%p213_p2)  ;;  %v831_v41 = vld [vmem:[%s1890_s3 + $0x98] sm:$0xff] (!%p213_p2) }
   0xa   : > { %1255 = vmatprep.subr.bf16.mxu0 (!%p213_p2), %v1254_v5  ;;  %v1268_v33 = vpack.c.bf16 (!%p213_p2), %v813_v32, %v812_v31  ;;  %v861_v35 = vld [vmem:[%s1890_s3 + $0x188] sm:$0xff] (!%p213_p2)  ;;  %v844_v37 = vld [vmem:[%s1890_s3 + $0x100] sm:$0xff] (!%p213_p2)  ;;  %v814_v42 = vld [vmem:[%s1890_s3 + $0x10] sm:$0xff] (!%p213_p2)  ;;  %v1270_v44 = vpack.c.bf16 (!%p213_p2), %v831_v41, %v830_v39 }
   0xb   : > { %1267 = vmatprep.subr.bf16.mxu1 (!%p213_p2), %v1266_v30  ;;  %v1298_v36 = vpack.c.bf16 (!%p213_p2), %v861_v35, %v860_v34  ;;  %v845_v38 = vld [vmem:[%s1890_s3 + $0x108] sm:$0xff] (!%p213_p2)  ;;  %v815_v43 = vld [vmem:[%s1890_s3 + $0x18] sm:$0xff] (!%p213_p2)  ;;  %v862_v46 = vld [vmem:[%s1890_s3 + $0x190] sm:$0xff] (!%p213_p2) }
   0xc   : > { %1269 = vmatpush3.bf16.msra.mxu1 (!%p213_p2), %v1268_v33  ;;  %v1300_v40 = vpack.c.bf16 (!%p213_p2), %v845_v38, %v844_v37  ;;  %v1272_v45 = vpack.c.bf16 (!%p213_p2), %v815_v43, %v814_v42  ;;  %v863_v47 = vld [vmem:[%s1890_s3 + $0x198] sm:$0xff] (!%p213_p2)  ;;  %v846_v49 = vld [vmem:[%s1890_s3 + $0x110] sm:$0xff] (!%p213_p2)  ;;  %v832_v51 = vld [vmem:[%s1890_s3 + $0xa0] sm:$0xff] (!%p213_p2) }
   0xd   : > { %s1895_s22 = smov (!%p241_p3, %s1086_s22), 1  ;;  %1257 = vmatpush3.bf16.msra.mxu0 %v1254_v5  ;;  %1271 = vmatprep.subr.bf16.mxu1 %v1270_v44  ;;  %v1302_v48 = vpack.c.bf16 %v863_v47, %v862_v46  ;;  %v847_v50 = vld [vmem:[%s1890_s3 + $0x118] sm:$0xff]  ;;  %v833_v53 = vld [vmem:[%s1890_s3 + $0xa8] sm:$0xff]  ;;  %v816_v55 = vld [vmem:[%s1890_s3 + $0x20] sm:$0xff] }
   0xe   : > { %s1115_s11 = sshll.u32 %s1895_s22, 7  ;;  %1259 = vmatprep.subr.bf16.mxu0 %v1258_v8  ;;  %v1304_v52 = vpack.c.bf16 %v847_v50, %v846_v49  ;;  %v1274_v54 = vpack.c.bf16 %v833_v53, %v832_v51  ;;  %v817_v56 = vld [vmem:[%s1890_s3 + $0x28] sm:$0xff]  ;;  %v864_v58 = vld [vmem:[%s1890_s3 + $0x1a0] sm:$0xff]  ;;  %v834_v63 = vld [vmem:[%s1890_s3 + $0xb0] sm:$0xff]  ;;  %s1093_s19 = sshll.u32 %s1895_s22, 3 }
   0xf   : > { %s1419_s14 = scalar_lea.vmem %s1887_s0, %s1115_s11  ;;  %v1276_v57 = vpack.c.bf16 %v817_v56, %v816_v55  ;;  %v865_v59 = vld [vmem:[%s1890_s3 + $0x1a8] sm:$0xff]  ;;  %v848_v61 = vld [vmem:[%s1890_s3 + $0x120] sm:$0xff]  ;;  %v835_v1 = vld [vmem:[%s1890_s3 + $0xb8] sm:$0xff]  ;;  %s249_s26 = scalar_lea.vmem %s1893_s6, %s1093_s19 }
  0x10   : > { %v250_v11 = vld [vmem:[%s1419_s14] sm:$0xff]  ;;  %v251_v13 = vld [vmem:[%s1419_s14 + $0x8] sm:$0xff]  ;;  %v252_v14 = vld [vmem:[%s1419_s14 + $0x10] sm:$0xff]  ;;  %1273 = vmatpush3.bf16.msra.mxu1 %v1272_v45  ;;  %v1306_v60 = vpack.c.bf16 %v865_v59, %v864_v58  ;;  %v1278_v4 = vpack.c.bf16 %v835_v1, %v834_v63 }
  0x11   : > { %1226 = vmatprep.mubr.msk.f32.mxu0 %vm274_vm0, %v250_v11  ;;  %1261 = vmatpush3.bf16.msra.mxu0 %v1258_v8  ;;  %v253_v15 = vld [vmem:[%s1419_s14 + $0x18] sm:$0xff]  ;;  %v254_v16 = vld [vmem:[%s1419_s14 + $0x20] sm:$0xff]  ;;  %v255_v17 = vld [vmem:[%s1419_s14 + $0x28] sm:$0xff] }
  0x12   : > { %1263 = vmatprep.subr.bf16.mxu0 %v1262_v12  ;;  %v256_v18 = vld [vmem:[%s1419_s14 + $0x30] sm:$0xff]  ;;  %v257_v19 = vld [vmem:[%s1419_s14 + $0x38] sm:$0xff]  ;;  %v258_v20 = vld [vmem:[%s1419_s14 + $0x40] sm:$0xff]  ;;  %1275 = vmatprep.subr.bf16.mxu1 %v1274_v54 }
  0x13   : > { %v259_v21 = vld [vmem:[%s1419_s14 + $0x48] sm:$0xff]  ;;  %v260_v22 = vld [vmem:[%s1419_s14 + $0x50] sm:$0xff]  ;;  %v261_v23 = vld [vmem:[%s1419_s14 + $0x58] sm:$0xff] }
  0x14   : > { %v262_v24 = vld [vmem:[%s1419_s14 + $0x60] sm:$0xff]  ;;  %v263_v25 = vld [vmem:[%s1419_s14 + $0x68] sm:$0xff]  ;;  %v264_v26 = vld [vmem:[%s1419_s14 + $0x70] sm:$0xff]  ;;  %1277 = vmatpush3.bf16.msra.mxu1 %v1276_v57 }
  0x15   : > { %1265 = vmatpush3.bf16.msra.mxu0 %v1262_v12  ;;  %v265_v27 = vld [vmem:[%s1419_s14 + $0x78] sm:$0xff]  ;;  %v849_v62 = vld [vmem:[%s1890_s3 + $0x128] sm:$0xff]  ;;  %v818_v2 = vld [vmem:[%s1890_s3 + $0x30] sm:$0xff]  ;;  %1279 = vmatprep.subr.bf16.mxu1 %v1278_v4 }
  0x16   : > { %1299 = vmatprep.subr.bf16.mxu0 %v1298_v36  ;;  %v1308_v0 = vpack.c.bf16 %v849_v62, %v848_v61  ;;  %v819_v3 = vld [vmem:[%s1890_s3 + $0x38] sm:$0xff]  ;;  %v866_v6 = vld [vmem:[%s1890_s3 + $0x1b0] sm:$0xff]  ;;  %v836_v11 = vld [vmem:[%s1890_s3 + $0xc0] sm:$0xff] }
  0x17   : > { %v1280_v5 = vpack.c.bf16 %v819_v3, %v818_v2  ;;  %v867_v7 = vld [vmem:[%s1890_s3 + $0x1b8] sm:$0xff]  ;;  %v850_v9 = vld [vmem:[%s1890_s3 + $0x130] sm:$0xff]  ;;  %v840_v36 = vld [vmem:[%s1890_s3 + $0xe0] sm:$0xff] }
  0x18   : > { %1227 = vmatmul.mubr.msk.f32.vlgmr.msra.gmra.mrb[0].mxu0 %vm274_vm0, %v251_v13  ;;  %v1310_v8 = vpack.c.bf16 %v867_v7, %v866_v6  ;;  %v851_v10 = vld [vmem:[%s1890_s3 + $0x138] sm:$0xff]  ;;  %v837_v13 = vld [vmem:[%s1890_s3 + $0xc8] sm:$0xff]  ;;  %v870_v29 = vld [vmem:[%s1890_s3 + $0x1d0] sm:$0xff] }
  0x19   : > { %1229 = vmatprep.mubr.msk.f32.mxu0 %vm274_vm0, %v252_v14  ;;  %1301 = vmatpush3.bf16.msra.mxu0 %v1300_v40  ;;  %v1312_v12 = vpack.c.bf16 %v851_v10, %v850_v9  ;;  %v820_v14 = vld [vmem:[%s1890_s3 + $0x40] sm:$0xff]  ;;  %v823_v28 = vld [vmem:[%s1890_s3 + $0x58] sm:$0xff]  ;;  %v854_v32 = vld [vmem:[%s1890_s3 + $0x150] sm:$0xff] }
  0x1a   : > { %1303 = vmatprep.subr.bf16.mxu0 %v1302_v48  ;;  %1281 = vmatpush3.bf16.msra.mxu1 %v1280_v5  ;;  %v871_v31 = vld [vmem:[%s1890_s3 + $0x1d8] sm:$0xff]  ;;  %v841_v37 = vld [vmem:[%s1890_s3 + $0xe8] sm:$0xff]  ;;  %v824_v38 = vld [vmem:[%s1890_s3 + $0x60] sm:$0xff] }
  0x1b   : > { %v855_v33 = vld [vmem:[%s1890_s3 + $0x158] sm:$0xff]  ;;  %v1318_v34 = vpack.c.bf16 %v871_v31, %v870_v29  ;;  %v1290_v39 = vpack.c.bf16 %v841_v37, %v840_v36  ;;  %v825_v40 = vld [vmem:[%s1890_s3 + $0x68] sm:$0xff]  ;;  %v872_v41 = vld [vmem:[%s1890_s3 + $0x1e0] sm:$0xff] }
  0x1c   : > { %1230 = vmatmul.mubr.msk.f32.gmra.mrb[2].mxu0 %vm274_vm0, %v253_v15  ;;  %v821_v15 = vld [vmem:[%s1890_s3 + $0x48] sm:$0xff]  ;;  %v1320_v35 = vpack.c.bf16 %v855_v33, %v854_v32  ;;  %v1292_v43 = vpack.c.bf16 %v825_v40, %v824_v38  ;;  %v856_v45 = vld [vmem:[%s1890_s3 + $0x160] sm:$0xff]  ;;  %v842_v47 = vld [vmem:[%s1890_s3 + $0xf0] sm:$0xff] }
  0x1d   : > { %1232 = vmatprep.mubr.msk.f32.mxu0 %vm274_vm0, %v254_v16  ;;  %1305 = vmatpush3.bf16.msra.mxu0 %v1304_v52  ;;  %v1282_v16 = vpack.c.bf16 %v837_v13, %v836_v11  ;;  %v873_v42 = vld [vmem:[%s1890_s3 + $0x1e8] sm:$0xff]  ;;  %v843_v48 = vld [vmem:[%s1890_s3 + $0xf8] sm:$0xff]  ;;  %v826_v49 = vld [vmem:[%s1890_s3 + $0x70] sm:$0xff] }
  0x1e   : > { %1307 = vmatprep.subr.bf16.mxu0 %v1306_v60  ;;  %v1322_v44 = vpack.c.bf16 %v873_v42, %v872_v41  ;;  %v857_v46 = vld [vmem:[%s1890_s3 + $0x168] sm:$0xff]  ;;  %v827_v50 = vld [vmem:[%s1890_s3 + $0x78] sm:$0xff]  ;;  %v1294_v52 = vpack.c.bf16 %v843_v48, %v842_v47  ;;  %v874_v53 = vld [vmem:[%s1890_s3 + $0x1f0] sm:$0xff] }
  0x1f   : > { %1283 = vmatprep.subr.bf16.mxu1 %v1282_v16  ;;  %v1324_v51 = vpack.c.bf16 %v857_v46, %v856_v45  ;;  %v875_v54 = vld [vmem:[%s1890_s3 + $0x1f8] sm:$0xff]  ;;  %v1296_v55 = vpack.c.bf16 %v827_v50, %v826_v49  ;;  %v858_v57 = vld [vmem:[%s1890_s3 + $0x170] sm:$0xff] }
  0x20   : > { %1233 = vmatmul.mubr.msk.f32.gmra.mrb[4].mxu0 %vm274_vm0, %v255_v17  ;;  %v1284_v17 = vpack.c.bf16 %v821_v15, %v820_v14  ;;  %v1326_v56 = vpack.c.bf16 %v875_v54, %v874_v53  ;;  %v859_v58 = vld [vmem:[%s1890_s3 + $0x178] sm:$0xff] }
  0x21   : > { %1235 = vmatprep.mubr.msk.f32.mxu0 %vm274_vm0, %v256_v18  ;;  %1309 = vmatpush3.bf16.msra.mxu0 %v1308_v0  ;;  %v868_v18 = vld [vmem:[%s1890_s3 + $0x1c0] sm:$0xff]  ;;  %v1328_v59 = vpack.c.bf16 %v859_v58, %v858_v57 }
  0x22   : > { %1311 = vmatprep.subr.bf16.mxu0 %v1310_v8  ;;  %1285 = vmatpush3.bf16.msra.mxu1 %v1284_v17  ;;  %v1654_v17 = vld [vmem:[%s1889_s2] ss:$0 sm:$0xff] }
  0x24   : > { %1236 = vmatmul.mubr.msk.f32.gmra.mrb[6].mxu0 %vm274_vm0, %v257_v19  ;;  %v869_v19 = vld [vmem:[%s1890_s3 + $0x1c8] sm:$0xff] }
  0x25   : > { %1238 = vmatprep.mubr.msk.f32.mxu0 %vm274_vm0, %v258_v20  ;;  %1313 = vmatpush3.bf16.msra.mxu0 %v1312_v12  ;;  %v852_v20 = vld [vmem:[%s1890_s3 + $0x140] sm:$0xff] }
  0x28   : > { %1239 = vmatmul.mubr.msk.f32.gmra.mrb[8].mxu0 %vm274_vm0, %v259_v21  ;;  %v1314_v21 = vpack.c.bf16 %v869_v19, %v868_v18 }
  0x29   : > { %1241 = vmatprep.mubr.msk.f32.mxu0 %vm274_vm0, %v260_v22  ;;  %v853_v22 = vld [vmem:[%s1890_s3 + $0x148] sm:$0xff] }
  0x2a   : > { %1315 = vmatprep.subr.bf16.mxu0 %v1314_v21 }
  0x2c   : > { %1242 = vmatmul.mubr.msk.f32.gmra.mrb[10].mxu0 %vm274_vm0, %v261_v23  ;;  %v838_v23 = vld [vmem:[%s1890_s3 + $0xd0] sm:$0xff] }
  0x2d   : > { %1244 = vmatprep.mubr.msk.f32.mxu0 %vm274_vm0, %v262_v24  ;;  %v839_v24 = vld [vmem:[%s1890_s3 + $0xd8] sm:$0xff] }
  0x30   : > { %1245 = vmatmul.mubr.msk.f32.gmra.mrb[12].mxu0 %vm274_vm0, %v263_v25  ;;  %v1316_v25 = vpack.c.bf16 %v853_v22, %v852_v20 }
  0x31   : > { %1247 = vmatprep.mubr.msk.f32.mxu0 %vm274_vm0, %v264_v26  ;;  %v1286_v26 = vpack.c.bf16 %v839_v24, %v838_v23 }
  0x32   : > { %1317 = vmatpush3.bf16.msra.mxu0 %v1316_v25 }
  0x33   : > { %1287 = vmatprep.subr.bf16.mxu1 %v1286_v26  ;;  %1319 = vmatprep.subr.bf16.mxu0 %v1318_v34 }
  0x34   : > { %1248 = vmatmul.mubr.msk.f32.gmra.mrb[14].mxu0 %vm274_vm0, %v265_v27  ;;  %v822_v27 = vld [vmem:[%s1890_s3 + $0x50] sm:$0xff] }
  0x35   : > { %v1288_v30 = vpack.c.bf16 %v823_v28, %v822_v27 }
  0x36   : > { %1321 = vmatpush3.bf16.msra.mxu0 %v1320_v35 }
  0x37   : > { %1289 = vmatpush3.bf16.msra.mxu1 %v1288_v30  ;;  %1323 = vmatprep.subr.bf16.mxu0 %v1322_v44 }
  0x38   : > { %1291 = vmatprep.subr.bf16.mxu1 %v1290_v39 }
  0x3a   : > { %1325 = vmatpush3.bf16.msra.mxu0 %v1324_v51 }
  0x3b   : > { %1293 = vmatpush3.bf16.msra.mxu1 %v1292_v43  ;;  %1327 = vmatprep.subr.bf16.mxu0 %v1326_v56 }
  0x3c   : > { %1295 = vmatprep.subr.bf16.mxu1 %v1294_v52 }
  0x3e   : > { %1329 = vmatpush3.bf16.msra.mxu0 %v1328_v59 }
  0x3f   : > { %1297 = vmatpush3.bf16.msra.mxu1 %v1296_v55 }
  0xeb   : > { %v1228_v60 = vpop.f32.mrb[0].mxu0 }
  0xec   : > { %v474_v61 = vrot.slane %v1228_v60, 4  ;;  %v389_v62 = vpop.f32.mrb[1].mxu0 }
  0xed   : > { %v468_v63 = vrot.slane %v389_v62, 4 }
  0xee   : > { %v475_v0 = vmax.f32 %v1228_v60, %v474_v61 }
  0xef   : > { %v469_v1 = vmax.f32 %v389_v62, %v468_v63  ;;  %v1231_v2 = vpop.f32.mrb[2].mxu0 }
  0xf0   : > { %v476_v3 = vrot.slane %v475_v0, 2  ;;  %v486_v4 = vrot.slane %v1231_v2, 4  ;;  %v399_v5 = vpop.f32.mrb[3].mxu0 }
  0xf1   : > { %v470_v6 = vrot.slane %v469_v1, 2  ;;  %v480_v7 = vrot.slane %v399_v5, 4 }
  0xf2   : > { %v477_v8 = vmax.f32 %v475_v0, %v476_v3  ;;  %v487_v9 = vmax.f32 %v1231_v2, %v486_v4 }
  0xf3   : > { %v471_v10 = vmax.f32 %v469_v1, %v470_v6  ;;  %v481_v11 = vmax.f32 %v399_v5, %v480_v7  ;;  %v1234_v12 = vpop.f32.mrb[4].mxu0 }
  0xf4   : > { %v478_v13 = vrot.slane %v477_v8, 1  ;;  %v488_v14 = vrot.slane %v487_v9, 2  ;;  %v498_v15 = vrot.slane %v1234_v12, 4  ;;  %v409_v16 = vpop.f32.mrb[5].mxu0 }
  0xf5   : > { %v472_v18 = vrot.slane %v471_v10, 1  ;;  %v482_v19 = vrot.slane %v481_v11, 2  ;;  %v492_v20 = vrot.slane %v409_v16, 4 }
  0xf6   : > { %v479_v21 = vmax.f32 %v477_v8, %v478_v13  ;;  %v489_v22 = vmax.f32 %v487_v9, %v488_v14  ;;  %v499_v23 = vmax.f32 %v1234_v12, %v498_v15 }
  0xf7   : > { %v473_v24 = vmax.f32 %v471_v10, %v472_v18  ;;  %v483_v25 = vmax.f32 %v481_v11, %v482_v19  ;;  %v493_v26 = vmax.f32 %v409_v16, %v492_v20  ;;  %v1237_v27 = vpop.f32.mrb[6].mxu0 }
  0xf8   : > { %v572_v28 = vadd.f32 %v1654_v17, %v479_v21  ;;  %v490_v29 = vrot.slane %v489_v22, 1  ;;  %v500_v30 = vrot.slane %v499_v23, 2  ;;  %v510_v31 = vrot.slane %v1237_v27, 4  ;;  %v419_v32 = vpop.f32.mrb[7].mxu0 }
  0xf9   : > { %v571_v33 = vadd.f32 %v1654_v17, %v473_v24  ;;  %v484_v34 = vrot.slane %v483_v25, 1  ;;  %v494_v35 = vrot.slane %v493_v26, 2  ;;  %v504_v36 = vrot.slane %v419_v32, 4 }
  0xfa   : > { %v1658_v37 = vmax.f32 %v572_v28, 0.0  ;;  %v491_v38 = vmax.f32 %v489_v22, %v490_v29  ;;  %v501_v39 = vmax.f32 %v499_v23, %v500_v30  ;;  %v511_v40 = vmax.f32 %v1237_v27, %v510_v31 }
  0xfb   : > { %v1660_v41 = vmax.f32 %v571_v33, 0.0  ;;  %v485_v42 = vmax.f32 %v483_v25, %v484_v34  ;;  %v495_v43 = vmax.f32 %v493_v26, %v494_v35  ;;  %v505_v44 = vmax.f32 %v419_v32, %v504_v36  ;;  %v1240_v45 = vpop.f32.mrb[8].mxu0 }
  0xfc   : > { %v1664_v46 = vmul.f32 %v1658_v37, %v1658_v37  ;;  %v751_v47 = vrot.slane %v1658_v37, 7  ;;  %v574_v48 = vadd.f32 %v1654_v17, %v491_v38  ;;  %v502_v49 = vrot.slane %v501_v39, 1  ;;  %v429_v50 = vpop.f32.mrb[9].mxu0 }
  0xfd   : > { %v1670_v51 = vmul.f32 %v1660_v41, %v1660_v41  ;;  %v573_v52 = vadd.f32 %v1654_v17, %v485_v42  ;;  %v496_v53 = vrot.slane %v495_v43, 1  ;;  %v512_v54 = vrot.slane %v511_v40, 2 }
  0xfe   : > { %v681_v55 = vrot.slane %v1664_v46, 7  ;;  %v1674_v56 = vmax.f32 %v574_v48, 0.0  ;;  %v503_v57 = vmax.f32 %v501_v39, %v502_v49  ;;  %v506_v58 = vrot.slane %v505_v44, 2 }
  0xff   : > { %v1676_v59 = vmax.f32 %v573_v52, 0.0  ;;  %v497_v60 = vmax.f32 %v495_v43, %v496_v53  ;;  %v513_v61 = vmax.f32 %v511_v40, %v512_v54  ;;  %v522_v62 = vrot.slane %v1240_v45, 4  ;;  %v1243_v63 = vpop.f32.mrb[10].mxu0 }
 0x100   : > { %v576_v0 = vadd.f32 %v1654_v17, %v503_v57  ;;  %v507_v1 = vmax.f32 %v505_v44, %v506_v58  ;;  %v516_v2 = vrot.slane %v429_v50, 4  ;;  %v534_v3 = vrot.slane %v1243_v63, 4  ;;  %v439_v4 = vpop.f32.mrb[11].mxu0 }
 0x101   : > { %v753_v5 = vrot.slane %v1676_v59, 6  ;;  %v575_v6 = vadd.f32 %v1654_v17, %v497_v60  ;;  %v514_v7 = vrot.slane %v513_v61, 1  ;;  %v523_v8 = vmax.f32 %v1240_v45, %v522_v62 }
 0x102   : > { %v1681_v9 = vmax.f32 %v576_v0, 0.0  ;;  %v508_v10 = vrot.slane %v507_v1, 1  ;;  %v517_v11 = vmax.f32 %v429_v50, %v516_v2  ;;  %v535_v12 = vmax.f32 %v1243_v63, %v534_v3 }
 0x103   : > { %v1683_v13 = vmax.f32 %v575_v6, 0.0  ;;  %v515_v14 = vmax.f32 %v513_v61, %v514_v7  ;;  %v524_v15 = vrot.slane %v523_v8, 2  ;;  %v528_v16 = vrot.slane %v439_v4, 4  ;;  %v1246_v18 = vpop.f32.mrb[12].mxu0 }
 0x104   : > { %v509_v19 = vmax.f32 %v507_v1, %v508_v10  ;;  %v518_v20 = vrot.slane %v517_v11, 2  ;;  %v536_v21 = vrot.slane %v535_v12, 2  ;;  %v546_v22 = vrot.slane %v1246_v18, 4  ;;  %v449_v23 = vpop.f32.mrb[13].mxu0 }
 0x105   : > { %v578_v24 = vadd.f32 %v1654_v17, %v515_v14  ;;  %v525_v25 = vmax.f32 %v523_v8, %v524_v15  ;;  %v529_v26 = vmax.f32 %v439_v4, %v528_v16  ;;  %v540_v27 = vrot.slane %v449_v23, 4 }
 0x106   : > { %v577_v28 = vadd.f32 %v1654_v17, %v509_v19  ;;  %v519_v29 = vmax.f32 %v517_v11, %v518_v20  ;;  %v537_v30 = vmax.f32 %v535_v12, %v536_v21  ;;  %v547_v31 = vmax.f32 %v1246_v18, %v546_v22 }
 0x107   : > { %v1687_v32 = vmax.f32 %v578_v24, 0.0  ;;  %v526_v33 = vrot.slane %v525_v25, 1  ;;  %v530_v34 = vrot.slane %v529_v26, 2  ;;  %v541_v35 = vmax.f32 %v449_v23, %v540_v27  ;;  %v1249_v36 = vpop.f32.mrb[14].mxu0 }
 0x108   : > { %v1689_v38 = vmax.f32 %v577_v28, 0.0  ;;  %v520_v39 = vrot.slane %v519_v29, 1  ;;  %v538_v40 = vrot.slane %v537_v30, 1  ;;  %v548_v42 = vrot.slane %v547_v31, 2  ;;  %v459_v43 = vpop.f32.mrb[15].mxu0 }
 0x109   : > { %v527_v44 = vmax.f32 %v525_v25, %v526_v33  ;;  %v531_v45 = vmax.f32 %v529_v26, %v530_v34  ;;  %v542_v48 = vrot.slane %v541_v35, 2  ;;  %v558_v49 = vrot.slane %v1249_v36, 4 }
 0x10a   : > { %v521_v50 = vmax.f32 %v519_v29, %v520_v39  ;;  %v539_v52 = vmax.f32 %v537_v30, %v538_v40  ;;  %v549_v53 = vmax.f32 %v547_v31, %v548_v42  ;;  %v552_v54 = vrot.slane %v459_v43, 4 }
 0x10b   : > { %v580_v57 = vadd.f32 %v1654_v17, %v527_v44  ;;  %v532_v58 = vrot.slane %v531_v45, 1  ;;  %v543_v60 = vmax.f32 %v541_v35, %v542_v48  ;;  %v559_v61 = vmax.f32 %v1249_v36, %v558_v49 }
 0x10c   : > { %v579_v62 = vadd.f32 %v1654_v17, %v521_v50  ;;  %v582_v63 = vadd.f32 %v1654_v17, %v539_v52  ;;  %v550_v0 = vrot.slane %v549_v53, 1  ;;  %v553_v1 = vmax.f32 %v459_v43, %v552_v54 }
 0x10d   : > { %v1694_v2 = vmax.f32 %v580_v57, 0.0  ;;  %v533_v3 = vmax.f32 %v531_v45, %v532_v58  ;;  %v544_v4 = vrot.slane %v543_v60, 1  ;;  %v560_v6 = vrot.slane %v559_v61, 2 }
 0x10e   : > { %v1696_v7 = vmax.f32 %v579_v62, 0.0  ;;  %v1698_v8 = vmax.f32 %v582_v63, 0.0  ;;  %v551_v10 = vmax.f32 %v549_v53, %v550_v0  ;;  %v554_v11 = vrot.slane %v553_v1, 2 }
 0x10f   : > { %v1702_v12 = vmul.f32 %v1694_v2, %v1658_v37  ;;  %v612_v14 = vsub.f32 %v1658_v37, %v1694_v2  ;;  %v1708_v15 = vmul.f32 %v1694_v2, %v1694_v2  ;;  %v774_v16 = vrot.slane %v1694_v2, 7 }
 0x110   : > { %v1713_v18 = vmul.f32 %v1696_v7, %v1660_v41  ;;  %v611_v19 = vsub.f32 %v1660_v41, %v1696_v7  ;;  %v1719_v20 = vmul.f32 %v1696_v7, %v1696_v7  ;;  %v614_v21 = vsub.f32 %v1674_v56, %v1698_v8 }
 0x111   : > { %v1723_v22 = vand.u32 2147483647, %v612_v14  ;;  %v651_v23 = vrot.slane %v1702_v12, 7  ;;  %v704_v24 = vrot.slane %v1708_v15, 7  ;;  %v581_v25 = vadd.f32 %v1654_v17, %v533_v3 }
 0x112   : > { %v1728_v26 = vand.u32 2147483647, %v611_v19  ;;  %v1730_v27 = vand.u32 2147483647, %v614_v21  ;;  %v584_v28 = vadd.f32 %v1654_v17, %v551_v10  ;;  %v545_v29 = vmax.f32 %v543_v60, %v544_v4 }
 0x113   : > { %v797_v30 = vrot.slane %v1723_v22, 7  ;;  %v597_v31 = vmax.f32 %v581_v25, 0.0  ;;  %v561_v33 = vmax.f32 %v559_v61, %v560_v6  ;;  %v555_v34 = vmax.f32 %v553_v1, %v554_v11 }
 0x114   : > { %v801_v35 = vrot.slane %v1730_v27, 5  ;;  %v1735_v36 = vmax.f32 %v584_v28, 0.0  ;;  %v583_v39 = vadd.f32 %v1654_v17, %v545_v29  ;;  %v629_v40 = vmul.f32 %v1676_v59, %v1676_v59 }
 0x115   : > { %v1741_v42 = vmul.f32 %v597_v31, %v1676_v59  ;;  %v613_v43 = vsub.f32 %v1676_v59, %v597_v31  ;;  %v1744_v44 = vmul.f32 %v597_v31, %v597_v31  ;;  %v562_v45 = vrot.slane %v561_v33, 1 }
 0x116   : > { %v1746_v48 = vmax.f32 %v583_v39, 0.0  ;;  %v556_v49 = vrot.slane %v555_v34, 1  ;;  %v630_v50 = vmul.f32 %v1674_v56, %v1674_v56  ;;  %v631_v52 = vmul.f32 %v1683_v13, %v1683_v13 }
 0x117   : > { %v1752_v53 = vand.u32 2147483647, %v613_v43  ;;  %v563_v54 = vmax.f32 %v561_v33, %v562_v45  ;;  %v632_v57 = vmul.f32 %v1681_v9, %v1681_v9  ;;  %v633_v58 = vmul.f32 %v1689_v38, %v1689_v38 }
 0x118   : > { %v615_v60 = vsub.f32 %v1683_v13, %v1746_v48  ;;  %v557_v61 = vmax.f32 %v555_v34, %v556_v49  ;;  %v634_v62 = vmul.f32 %v1687_v32, %v1687_v32  ;;  %v682_v63 = vsel %vm652_vm1, %v681_v55, %v1670_v51 }
 0x119   : > { %v799_v0 = vrot.slane %v1752_v53, 6  ;;  %v586_v1 = vadd.f32 %v1654_v17, %v563_v54  ;;  %v683_v2 = vrot.slane %v629_v40, 6  ;;  %v685_v3 = vrot.slane %v630_v50, 5 }
 0x11a   : > { %v1768_v4 = vand.u32 2147483647, %v615_v60  ;;  %v585_v6 = vadd.f32 %v1654_v17, %v557_v61  ;;  %v687_v10 = vrot.slane %v631_v52, 4  ;;  %v689_v11 = vrot.slane %v632_v57, 3 }
 0x11b   : > { %v1771_v14 = vmax.f32 %v586_v1, 0.0  ;;  %v684_v19 = vsel %vm655_vm2, %v683_v2, %v682_v63  ;;  %v691_v21 = vrot.slane %v633_v58, 2  ;;  %v693_v46 = vrot.slane %v634_v62, 1 }
 0x11c   : > { %v1774_v25 = vmax.f32 %v585_v6, 0.0  ;;  %v686_v51 = vsel %vm658_vm3, %v685_v3, %v684_v19  ;;  %v775_v55 = vsel %vm652_vm1, %v774_v16, %v1696_v7  ;;  %v776_v28 = vrot.slane %v597_v31, 6 }
 0x11d   : > { %v688_v29 = vsel %vm661_vm4, %v687_v10, %v686_v51  ;;  %v778_v17 = vrot.slane %v1698_v8, 5  ;;  %v780_v33 = vrot.slane %v1746_v48, 4  ;;  %v782_v34 = vrot.slane %v1735_v36, 3 }
 0x11e   : > { %v690_v39 = vsel %vm664_vm5, %v689_v11, %v688_v29  ;;  %v777_v40 = vsel %vm655_vm2, %v776_v28, %v775_v55  ;;  %v784_v43 = vrot.slane %v1774_v25, 2  ;;  %v786_v45 = vrot.slane %v1771_v14, 1 }
 0x11f   : > { %v692_v49 = vsel %vm667_vm6, %v691_v21, %v690_v39  ;;  %v779_v7 = vsel %vm658_vm3, %v778_v17, %v777_v40  ;;  %v752_v16 = vsel %vm652_vm1, %v751_v47, %v1660_v41  ;;  %v755_v31 = vrot.slane %v1674_v56, 5 }
 0x120   : > { %v694_v50 = vsel %vm670_vm7, %v693_v46, %v692_v49  ;;  %v781_v52 = vsel %vm661_vm4, %v780_v33, %v779_v7  ;;  %v754_v54 = vsel %vm655_vm2, %v753_v5, %v752_v16  ;;  %v757_v57 = vrot.slane %v1683_v13, 4 }
 0x121   : > { %721 = vadd.xlane.f32.xlu0 %v694_v50  ;;  %v783_v58 = vsel %vm664_vm5, %v782_v34, %v781_v52  ;;  %v756_v60 = vsel %vm658_vm3, %v755_v31, %v754_v54  ;;  %v759_v37 = vrot.slane %v1681_v9, 3  ;;  %v761_v41 = vrot.slane %v1689_v38, 2 }
 0x122   : > { %v785_v47 = vsel %vm667_vm6, %v784_v43, %v783_v58  ;;  %v758_v61 = vsel %vm661_vm4, %v757_v57, %v756_v60  ;;  %v763_v62 = vrot.slane %v1687_v32, 1  ;;  %v638_v59 = vmul.f32 %v1698_v8, %v1698_v8 }
 0x123   : > { %v787_v5 = vsel %vm670_vm7, %v786_v45, %v785_v47  ;;  %v760_v63 = vsel %vm664_vm5, %v759_v37, %v758_v61  ;;  %v639_v1 = vmul.f32 %v1746_v48, %v1746_v48  ;;  %v640_v2 = vmul.f32 %v1735_v36, %v1735_v36 }
 0x124   : > { %948 = vmatprep.mubr.f32.mxu1 %v787_v5  ;;  %v762_v3 = vsel %vm667_vm6, %v761_v41, %v760_v63  ;;  %v641_v6 = vmul.f32 %v1774_v25, %v1774_v25  ;;  %v642_v10 = vmul.f32 %v1771_v14, %v1771_v14  ;;  %v705_v11 = vsel %vm652_vm1, %v704_v24, %v1719_v20 }
 0x125   : > { %v764_v19 = vsel %vm670_vm7, %v763_v62, %v762_v3  ;;  %v706_v21 = vrot.slane %v1744_v44, 6  ;;  %v708_v46 = vrot.slane %v638_v59, 5  ;;  %v710_v51 = vrot.slane %v639_v1, 4 }
 0x126   : > { %949 = vmatmul.mubr.f32.vlgmr.msra.gmra.mrb[0].mxu1 %v764_v19  ;;  %v712_v55 = vrot.slane %v640_v2, 3  ;;  %v714_v28 = vrot.slane %v641_v6, 2  ;;  %v716_v29 = vrot.slane %v642_v10, 1  ;;  %v606_v17 = vmul.f32 %v1698_v8, %v1674_v56 }
 0x127   : > { %v707_v33 = vsel %vm655_vm2, %v706_v21, %v705_v11  ;;  %v607_v15 = vmul.f32 %v1746_v48, %v1683_v13  ;;  %v608_v20 = vmul.f32 %v1735_v36, %v1681_v9  ;;  %v609_v24 = vmul.f32 %v1774_v25, %v1689_v38 }
 0x128   : > { %v709_v44 = vsel %vm658_vm3, %v708_v46, %v707_v33  ;;  %v610_v34 = vmul.f32 %v1771_v14, %v1687_v32  ;;  %v653_v56 = vsel %vm652_vm1, %v651_v23, %v1713_v18  ;;  %v654_v8 = vrot.slane %v1741_v42, 6 }
 0x129   : > { %v711_v13 = vsel %vm661_vm4, %v710_v51, %v709_v44  ;;  %v657_v48 = vrot.slane %v606_v17, 5  ;;  %v660_v39 = vrot.slane %v607_v15, 4  ;;  %v663_v40 = vrot.slane %v608_v20, 3  ;;  %v1112_v20 = vld [vmem:[%s1892_s5] ss:$0 sm:$0xff] }
 0x12a   : > { %v713_v43 = vsel %vm664_vm5, %v712_v55, %v711_v13  ;;  %v656_v45 = vsel %vm655_vm2, %v654_v8, %v653_v56  ;;  %v666_v49 = vrot.slane %v609_v24, 2  ;;  %v669_v7 = vrot.slane %v610_v34, 1  ;;  %v1111_v55 = vld [vmem:[%s1891_s4] ss:$0 sm:$0xff] }
 0x12b   : > { %v715_v16 = vsel %vm667_vm6, %v714_v28, %v713_v43  ;;  %v659_v31 = vsel %vm658_vm3, %v657_v48, %v656_v45  ;;  %v616_v12 = vsub.f32 %v1681_v9, %v1735_v36  ;;  %v617_v18 = vsub.f32 %v1689_v38, %v1774_v25 }
 0x12c   : > { %v717_v23 = vsel %vm670_vm7, %v716_v29, %v715_v16  ;;  %v662_v42 = vsel %vm661_vm4, %v660_v39, %v659_v31  ;;  %v618_v50 = vsub.f32 %v1687_v32, %v1771_v14  ;;  %v798_v52 = vsel %vm652_vm1, %v797_v30, %v1728_v26 }
 0x12d   : > { %723 = vadd.xlane.f32.xlu0 %v717_v23  ;;  %v665_v54 = vsel %vm664_vm5, %v663_v40, %v662_v42  ;;  %v624_v57 = vand.u32 2147483647, %v616_v12  ;;  %v625_v9 = vand.u32 2147483647, %v617_v18  ;;  %v800_v38 = vsel %vm655_vm2, %v799_v0, %v798_v52 }
 0x12e   : > { %v668_v36 = vsel %vm667_vm6, %v666_v49, %v665_v54  ;;  %v626_v25 = vand.u32 2147483647, %v618_v50  ;;  %v802_v32 = vsel %vm658_vm3, %v801_v35, %v800_v38  ;;  %v803_v22 = vrot.slane %v1768_v4, 4 }
 0x12f   : > { %v671_v26 = vsel %vm670_vm7, %v669_v7, %v668_v36  ;;  %v805_v30 = vrot.slane %v624_v57, 3  ;;  %v807_v14 = vrot.slane %v625_v9, 2 }
 0x130   : > { %719 = vadd.xlane.f32.xlu1 %v671_v26  ;;  %1018 = vmatprep.mubr.f32.mxu0 %v671_v26  ;;  %v804_v58 = vsel %vm661_vm4, %v803_v22, %v802_v32  ;;  %v809_v0 = vrot.slane %v626_v25, 1 }
 0x131   : > { %v806_v53 = vsel %vm664_vm5, %v805_v30, %v804_v58 }
 0x132   : > { %v808_v60 = vsel %vm667_vm6, %v807_v14, %v806_v53 }
 0x133   : > { %v810_v37 = vsel %vm670_vm7, %v809_v0, %v808_v60 }
 0x134   : > { %1019 = vmatmul.mubr.f32.vlgmr.msra.gmra.mrb[16].mxu0 %v810_v37 }
 0x1ae   : > { %v722_v27 = vpop.xlane.xlu0 %721 }
 0x1af   : > { %vm727_vm9 = vcmp.eq.f32.partialorder %v722_v27, inf  ;;  %v730_v63 = vand.u32 2147483648, %v722_v27  ;;  %vm729_vm11 = vcmp.eq.f32.partialorder %v722_v27, 0.0 }
 0x1ba   : > { %v724_v35 = vpop.xlane.xlu0 %723 }
 0x1bb   : > { %1338 = vrsqrt.f32 %v724_v35  ;;  %vm734_vm8 = vcmp.eq.f32.partialorder %v724_v35, inf  ;;  %v737_v59 = vand.u32 2147483648, %v724_v35  ;;  %vm736_vm10 = vcmp.eq.f32.partialorder %v724_v35, 0.0 }
 0x1bc   : > { %1340 = vrsqrt.f32 %v722_v27 }
 0x1bd   : > { %v720_v46 = vpop.xlane.xlu1 %719 }
 0x1c5   : > { %v1339_v4 = vpop.eup %1338 }
 0x1c6   : > { %v1341_v41 = vpop.eup %1340  ;;  %v733_v47 = vmul.f32 %v1339_v4, %v724_v35 }
 0x1c7   : > { %v726_v61 = vmul.f32 %v1341_v41, %v722_v27 }
 0x1c8   : > { %v735_v62 = vsel %vm734_vm8, %v724_v35, %v733_v47 }
 0x1c9   : > { %v728_v5 = vsel %vm727_vm9, %v722_v27, %v726_v61  ;;  %v738_v1 = vsel %vm736_vm10, %v737_v59, %v735_v62 }
 0x1ca   : > { %v731_v2 = vsel %vm729_vm11, %v730_v63, %v728_v5 }
 0x1cb   : > { %v739_v3 = vmul.f32 %v738_v1, %v731_v2 }
 0x1cd   : > { %v740_v6 = vmax.f32 %v739_v3, 1e-08 }
 0x1cf   : > { %1342 = vrcp.f32 %v740_v6 }
 0x1d9   : > { %v1343_v21 = vpop.eup %1342 }
 0x1da   : > { %v742_v51 = vmul.f32 %v1343_v21, %v720_v46 }
 0x1dc   : > { %v883_v28 = vmul.f32 %v1111_v55, %v742_v51 }
 0x1f9   : > { %v1172_v10 = vpop.f32.mrb[0].mxu1 }
 0x1fa   : > { %v1173_v11 = vpop.f32.mrb[1].mxu1 }
 0x1fb   : > { %v1174_v19 = vadd.f32 %v1173_v11, %v1172_v10 }
 0x1fd   : > { %v951_v29 = vadd.f32 %v1174_v19, %v883_v28 }
 0x207   : > { %v1207_v17 = vpop.f32.mrb[16].mxu0 }
 0x208   : > { %v1208_v33 = vpop.f32.mrb[17].mxu0 }
 0x209   : > { %v1209_v15 = vadd.f32 %v1208_v33, %v1207_v17 }
 0x20b   : > { %v1021_v24 = vadd.f32 %v1209_v15, %v951_v29 }
 0x20d   : > { %v1031_v44 = vadd.f32 %v1112_v20, %v1021_v24 }
 0x20f   : > { %1032 = vst [vmem:[%s249_s26] sm:$0xff] %v1031_v44 }
 0x210 PF: > { %s16_s21 = sadd.s32 1, %s1350_s21  }
 0x211   : > { %p13_p4 = scmp.ge.s32.totalorder %s16_s21, 4  }
 0x213   :  { %15 = sbr.rel (!%p13_p4) target bundleno = 1 (0x1), region = 74 }

</bundles_post_ra>
